<compile_context>
chip_gen: v7x
topology: tpu7x:2x2x1
jax: 0.10.0
libtpu: 0.0.40
codegen_flags: <defaults>
</compile_context>

<pallas_src>
import jax
import jax.numpy as jnp
from jax.experimental import pallas as pl
from jax.experimental.pallas import tpu as pltpu


def _round_up(x, m):
    return (x + m - 1) // m * m


def _cdiv(a, b):
    return (a + b - 1) // b


def _pad_dim(d):
    # 128-lane padding is enough for small dims; 256 keeps the v6e/v7x 256x256
    # MXU fully fed on the tail tile for larger ones (one-time layout cost).
    return _round_up(d, 128) if d <= 128 else _round_up(d, 256)


def _vmem_capacity_bytes():
    """Best-effort physical VMEM query; conservative 64 MiB (v7x) fallback."""
    try:
        info = pltpu.get_tpu_info()
        for name in ("vmem_capacity_bytes", "vmem_bytes", "vmem_capacity"):
            v = getattr(info, name, None)
            if v:
                return int(v)
    except Exception:
        pass
    return 64 << 20


_ROW_GRAN = 16          # row-tile granularity safe for bf16 (and f32) sublanes
_MARGIN = 6 << 20       # compile-time VMEM headroom over the computed blocks


def ffn_resident_kernel(x_ref, w1_ref, b1_ref, w2_ref, b2_ref, o_ref):
    # Whole FFN for one row tile; W1/W2/biases have constant index_maps so they
    # stay VMEM-resident across the row-tile grid (weights read from HBM once).
    cd = w1_ref.dtype
    h = jnp.dot(x_ref[...].astype(cd), w1_ref[...],
                preferred_element_type=jnp.float32)
    h = jnp.maximum(h + b1_ref[...], 0.0)
    # TODO(synk): training-mode dropout (pltpu.prng_seed + prng_random_bits
    # Bernoulli mask scaled by 1/(1-p)); eval mode == identity.
    y = jnp.dot(h.astype(w2_ref.dtype), w2_ref[...],
                preferred_element_type=jnp.float32)
    o_ref[...] = (y + b2_ref[...]).astype(o_ref.dtype)


def ffn_reduction_kernel(x_ref, w1_ref, b1_ref, w2_ref, b2_ref, o_ref, acc_ref):
    # grid = (row tiles, d_ff slabs); axis 1 streams W1 columns / W2 rows and
    # accumulates into a (tm, dmp) f32 scratch.  Bias1 + ReLU are separable
    # over d_ff, so they are applied per slab.
    k = pl.program_id(1)
    last = pl.num_programs(1) - 1

    @pl.when(k == 0)
    def _():
        # Seed the accumulator with b2: removes the epilogue full-tile add.
        acc_ref[...] = jnp.broadcast_to(b2_ref[...], acc_ref.shape)

    cd = w1_ref.dtype
    h = jnp.dot(x_ref[...].astype(cd), w1_ref[...],
                preferred_element_type=jnp.float32)
    h = jnp.maximum(h + b1_ref[...], 0.0)
    contrib = jnp.dot(h.astype(w2_ref.dtype), w2_ref[...],
                      preferred_element_type=jnp.float32)

    @pl.when(k != last)
    def _():
        acc_ref[...] += contrib

    @pl.when(k == last)
    def _():
        # Final slab writes the output directly (skips one acc store+reload).
        o_ref[...] = (acc_ref[...] + contrib).astype(o_ref.dtype)


def prepare_ffn_params(w1, b1, w2, b2, compute_dtype=jnp.bfloat16):
    """One-time layout prep: transpose nn.Linear weights to (in, out), zero-pad
    feature dims (lane-dense / MXU-aligned), cast weights to bf16; biases f32."""
    d_ff, d_model = w1.shape
    dmp = _pad_dim(d_model)
    dfp = _pad_dim(d_ff)
    w1_t = jnp.zeros((dmp, dfp), compute_dtype).at[:d_model, :d_ff].set(
        w1.T.astype(compute_dtype))
    w2_t = jnp.zeros((dfp, dmp), compute_dtype).at[:d_ff, :d_model].set(
        w2.T.astype(compute_dtype))
    b1_p = jnp.zeros((1, dfp), jnp.float32).at[:, :d_ff].set(
        b1.reshape(1, d_ff).astype(jnp.float32))
    b2_p = jnp.zeros((1, dmp), jnp.float32).at[:, :d_model].set(
        b2.reshape(1, d_model).astype(jnp.float32))
    return w1_t, b1_p, w2_t, b2_p


def feed_forward(x, w1_t, b1_p, w2_t, b2_p, *, tm=None, tf=None,
                 weight_resident=None):
    """x: (B, S, d_model); params from prepare_ffn_params (padded, (in, out))."""
    B, S, d_model = x.shape
    dmp, dfp = w1_t.shape
    compute_dtype = w1_t.dtype
    out_dtype = x.dtype
    M = B * S

    cbytes = jnp.dtype(compute_dtype).itemsize
    obytes = jnp.dtype(out_dtype).itemsize
    xbytes_budget = max(jnp.dtype(x.dtype).itemsize, cbytes)

    vmem_cap = _vmem_capacity_bytes()
    # ~100 MiB usable on 128 MiB parts (v5e/v6e), ~50 MiB on 64 MiB (v7x/TC).
    budget = max(int(min(vmem_cap * 0.8, vmem_cap - (12 << 20))), 24 << 20)

    def reduction_bytes(tm_, tf_):
        return (2 * tm_ * dmp * xbytes_budget       # x tile (double-buffered)
                + 2 * dmp * tf_ * cbytes            # W1 slab
                + 2 * tf_ * dmp * cbytes            # W2 slab
                + 2 * tf_ * 4 + 2 * dmp * 4         # bias slabs
                + 2 * tm_ * dmp * obytes            # output tile
                + tm_ * dmp * 4                     # f32 accumulator scratch
                + tm_ * tf_ * 4)                    # post-ReLU intermediate

    def resident_bytes(tm_):
        return (2 * tm_ * dmp * xbytes_budget
                + 2 * dmp * dfp * cbytes + 2 * dfp * dmp * cbytes
                + 2 * dfp * 4 + 2 * dmp * 4
                + 2 * tm_ * dmp * obytes
                + tm_ * dfp * 4)                    # full post-ReLU intermediate

    # ---- Row tile: roofline-driven per-generation target, >=2 tiles for the
    # ---- dual-TC parallel split, minimal over-padding, sublane-aligned. -----
    if tm is None:
        target_tm = 1024 if vmem_cap >= (96 << 20) else 512
        n_tiles = _cdiv(M, target_tm)
        if M >= 2 * _ROW_GRAN:
            n_tiles = max(n_tiles, 2)
        tm = _round_up(_cdiv(M, n_tiles), _ROW_GRAN)
    tm = max(_ROW_GRAN,
             _round_up(min(tm, _round_up(M, _ROW_GRAN)), _ROW_GRAN))
    # Shrink tm until even the smallest streaming config fits the VMEM budget.
    while tm > _ROW_GRAN and reduction_bytes(tm, 128) + _MARGIN > budget:
        tm = max(_ROW_GRAN, _round_up(tm // 2, _ROW_GRAN))
    # TODO(synk): for very large d_model (>= ~8K) add an output-column tiling
    # axis so the (tm, dmp) accumulator/out tile fit v7x's 64 MiB VMEM.
    M_pad = _round_up(M, tm)
    n_row_tiles = M_pad // tm

    # ---- Activations: skip the wrapper pad/cast pass when layout already fits;
    # ---- cast to bf16 inside the kernel instead. -----------------------------
    needs_pad = (d_model != dmp) or (M_pad != M)
    if needs_pad:
        x2d = jnp.zeros((M_pad, dmp), compute_dtype)
        x2d = x2d.at[:M, :d_model].set(
            x.reshape(M, d_model).astype(compute_dtype))
    else:
        x2d = x.reshape(M, d_model)
    xbytes = jnp.dtype(x2d.dtype).itemsize

    # ---- Path selection: weight-resident when both bf16 weights fit VMEM. ----
    if weight_resident is None:
        weight_resident = resident_bytes(tm) + _MARGIN <= budget

    flops = 4 * M_pad * dmp * dfp                   # two matmuls, 2*M*N*K each

    if weight_resident:
        block_bytes = resident_bytes(tm)
        vmem_limit = int(min(max(block_bytes + _MARGIN, 16 << 20), budget))
        bytes_accessed = int(M_pad * dmp * xbytes
                             + (w1_t.size + w2_t.size) * cbytes
                             + (b1_p.size + b2_p.size) * 4
                             + M_pad * dmp * obytes)
        out2d = pl.pallas_call(
            ffn_resident_kernel,
            out_shape=jax.ShapeDtypeStruct((M_pad, dmp), out_dtype),
            grid_spec=pltpu.PrefetchScalarGridSpec(
                num_scalar_prefetch=0,
                grid=(n_row_tiles,),
                in_specs=[
                    pl.BlockSpec((tm, dmp), lambda i: (i, 0)),   # x row tile
                    pl.BlockSpec((dmp, dfp), lambda i: (0, 0)),  # W1 (resident)
                    pl.BlockSpec((1, dfp), lambda i: (0, 0)),    # b1
                    pl.BlockSpec((dfp, dmp), lambda i: (0, 0)),  # W2 (resident)
                    pl.BlockSpec((1, dmp), lambda i: (0, 0)),    # b2
                ],
                out_specs=pl.BlockSpec((tm, dmp), lambda i: (i, 0)),
            ),
            compiler_params=pltpu.CompilerParams(
                dimension_semantics=("parallel",),
                vmem_limit_bytes=vmem_limit),
            cost_estimate=pl.CostEstimate(flops=flops, transcendentals=0,
                                          bytes_accessed=bytes_accessed),
        )(x2d, w1_t, b1_p, w2_t, b2_p)
    else:
        if tf is None:
            tf = 128
            for cand in (512, 256):
                if dfp % cand == 0 and reduction_bytes(tm, cand) + _MARGIN <= budget:
                    tf = cand
                    break
        tf = min(tf, dfp)
        assert dfp % tf == 0 and dmp % 128 == 0
        n_k = dfp // tf
        block_bytes = reduction_bytes(tm, tf)
        vmem_limit = int(min(max(block_bytes + _MARGIN, 16 << 20), budget))
        # Weights are re-streamed once per row tile: count that accurately.
        bytes_accessed = int(M_pad * dmp * xbytes
                             + n_row_tiles * (w1_t.size + w2_t.size) * cbytes
                             + n_row_tiles * (b1_p.size + b2_p.size) * 4
                             + M_pad * dmp * obytes)
        out2d = pl.pallas_call(
            ffn_reduction_kernel,
            out_shape=jax.ShapeDtypeStruct((M_pad, dmp), out_dtype),
            grid_spec=pltpu.PrefetchScalarGridSpec(
                num_scalar_prefetch=0,
                grid=(n_row_tiles, n_k),
                in_specs=[
                    pl.BlockSpec((tm, dmp), lambda i, k: (i, 0)),  # x row tile
                    pl.BlockSpec((dmp, tf), lambda i, k: (0, k)),  # W1 slab
                    pl.BlockSpec((1, tf), lambda i, k: (0, k)),    # b1 slab
                    pl.BlockSpec((tf, dmp), lambda i, k: (k, 0)),  # W2 slab
                    pl.BlockSpec((1, dmp), lambda i, k: (0, 0)),   # b2
                ],
                out_specs=pl.BlockSpec((tm, dmp), lambda i, k: (i, 0)),
                scratch_shapes=[pltpu.VMEM((tm, dmp), jnp.float32)],
            ),
            compiler_params=pltpu.CompilerParams(
                dimension_semantics=("parallel", "arbitrary"),
                vmem_limit_bytes=vmem_limit),
            cost_estimate=pl.CostEstimate(flops=flops, transcendentals=0,
                                          bytes_accessed=bytes_accessed),
        )(x2d, w1_t, b1_p, w2_t, b2_p)

    if M_pad == M and dmp == d_model:
        return out2d.reshape(B, S, d_model)
    return out2d[:M, :d_model].reshape(B, S, d_model)


def reference(x, w1, b1, w2, b2):
    h = jnp.maximum(jnp.einsum("bsd,fd->bsf", x, w1) + b1, 0.0)
    return jnp.einsum("bsf,df->bsd", h, w2) + b2


if __name__ == "__main__":
    # Small shapes consistent with the module's forward.
    B, S, d_model, d_ff = 2, 8, 32, 64

    key = jax.random.PRNGKey(0)
    kx, kw1, kb1, kw2, kb2 = jax.random.split(key, 5)

    x = jax.random.normal(kx, (B, S, d_model), dtype=jnp.float32)

    # Deterministic nn.Linear-style init (uniform in +-1/sqrt(fan_in)).
    lim1 = 1.0 / (d_model ** 0.5)
    lim2 = 1.0 / (d_ff ** 0.5)
    w1 = jax.random.uniform(kw1, (d_ff, d_model), jnp.float32, -lim1, lim1)
    b1 = jax.random.uniform(kb1, (d_ff,), jnp.float32, -lim1, lim1)
    w2 = jax.random.uniform(kw2, (d_model, d_ff), jnp.float32, -lim2, lim2)
    b2 = jax.random.uniform(kb2, (d_model,), jnp.float32, -lim2, lim2)

    # One-time weight layout prep (transpose + pad + bf16 cast).
    params = prepare_ffn_params(w1, b1, w2, b2)
    ref = reference(x, w1, b1, w2, b2)

    # 1) Default path (weight-resident fast path at these sizes).
    out_res = jax.block_until_ready(feed_forward(x, *params))
    assert out_res.shape == (B, S, d_model)
    assert jnp.allclose(out_res, ref, atol=2e-2, rtol=2e-2), "resident mismatch"

    # 2) Streaming / d_ff-reduction path (forced, to exercise both kernels).
    out_red = jax.block_until_ready(
        feed_forward(x, *params, weight_resident=False, tf=128))
    assert out_red.shape == (B, S, d_model)
    assert jnp.allclose(out_red, ref, atol=2e-2, rtol=2e-2), "streaming mismatch"

    print("KERNEL_OK")
</pallas_src>

<mosaic_0001>
module attributes {stable_mosaic.version = 11 : i64} {
  func.func @ffn_resident_kernel(%arg0: i32, %arg1: memref<16x128xbf16, #tpu.memory_space<vmem>>, %arg2: memref<128x128xbf16, #tpu.memory_space<vmem>>, %arg3: memref<1x128xf32, #tpu.memory_space<vmem>>, %arg4: memref<128x128xbf16, #tpu.memory_space<vmem>>, %arg5: memref<1x128xf32, #tpu.memory_space<vmem>>, %arg6: memref<16x128xf32, #tpu.memory_space<vmem>>) attributes {dimension_semantics = [#tpu.dimension_semantics<parallel>], iteration_bounds = array<i64: 1>, scalar_prefetch = 0 : i64, scratch_operands = 0 : i64, tpu.core_type = #tpu.core_type<tc>, window_params = [{transform_indices = @transform_0, window_bounds = array<i64: 16, 128>}, {pipeline_mode = #tpu.pipeline_mode<synchronous>, transform_indices = @transform_1, window_bounds = array<i64: 128, 128>}, {pipeline_mode = #tpu.pipeline_mode<synchronous>, transform_indices = @transform_2, window_bounds = array<i64: 1, 128>}, {pipeline_mode = #tpu.pipeline_mode<synchronous>, transform_indices = @transform_3, window_bounds = array<i64: 128, 128>}, {pipeline_mode = #tpu.pipeline_mode<synchronous>, transform_indices = @transform_4, window_bounds = array<i64: 1, 128>}, {transform_indices = @transform_5, window_bounds = array<i64: 16, 128>}]} {
    %c0 = arith.constant 0 : index
    %c0_0 = arith.constant 0 : index
    %0 = vector.load %arg1[%c0, %c0_0] : memref<16x128xbf16, #tpu.memory_space<vmem>>, vector<16x128xbf16>
    %c0_1 = arith.constant 0 : index
    %c0_2 = arith.constant 0 : index
    %1 = vector.load %arg2[%c0_1, %c0_2] : memref<128x128xbf16, #tpu.memory_space<vmem>>, vector<128x128xbf16>
    %cst = arith.constant dense<0.000000e+00> : vector<16x128xf32>
    %2 = tpu.matmul %0, %1, %cst {dimension_numbers = #tpu.dot_dimension_numbers<[1], [0], [0], [1], [0, 0, 1, 1], [], []>} : vector<16x128xbf16>, vector<128x128xbf16>, vector<16x128xf32> -> vector<16x128xf32>
    %c0_3 = arith.constant 0 : index
    %c0_4 = arith.constant 0 : index
    %3 = vector.load %arg3[%c0_3, %c0_4] : memref<1x128xf32, #tpu.memory_space<vmem>>, vector<1x128xf32>
    %4 = vector.broadcast %3 : vector<1x128xf32> to vector<16x128xf32>
    %5 = arith.addf %2, %4 : vector<16x128xf32>
    %cst_5 = arith.constant 0.000000e+00 : f32
    %6 = vector.broadcast %cst_5 : f32 to vector<16x128xf32>
    %7 = arith.maximumf %5, %6 : vector<16x128xf32>
    %8 = arith.truncf %7 : vector<16x128xf32> to vector<16x128xbf16>
    %c0_6 = arith.constant 0 : index
    %c0_7 = arith.constant 0 : index
    %9 = vector.load %arg4[%c0_6, %c0_7] : memref<128x128xbf16, #tpu.memory_space<vmem>>, vector<128x128xbf16>
    %cst_8 = arith.constant dense<0.000000e+00> : vector<16x128xf32>
    %10 = tpu.matmul %8, %9, %cst_8 {dimension_numbers = #tpu.dot_dimension_numbers<[1], [0], [0], [1], [0, 0, 1, 1], [], []>} : vector<16x128xbf16>, vector<128x128xbf16>, vector<16x128xf32> -> vector<16x128xf32>
    %c0_9 = arith.constant 0 : index
    %c0_10 = arith.constant 0 : index
    %11 = vector.load %arg5[%c0_9, %c0_10] : memref<1x128xf32, #tpu.memory_space<vmem>>, vector<1x128xf32>
    %12 = vector.broadcast %11 : vector<1x128xf32> to vector<16x128xf32>
    %13 = arith.addf %10, %12 : vector<16x128xf32>
    %c0_11 = arith.constant 0 : index
    %c0_12 = arith.constant 0 : index
    %14 = vector.load %arg6[%c0_11, %c0_12] : memref<16x128xf32, #tpu.memory_space<vmem>>, vector<16x128xf32>
    tpu.vector_store %arg6[%c0_11, %c0_12], %13 {strides = array<i32>} : memref<16x128xf32, #tpu.memory_space<vmem>>, vector<16x128xf32>,
    return
  }
  func.func @transform_0(%arg0: i32) -> (i32, i32) {
    %c0_i32 = arith.constant 0 : i32
    %c0_i32_0 = arith.constant 0 : i32
    return %arg0, %c0_i32 : i32, i32
  }
  func.func @transform_1(%arg0: i32) -> (i32, i32) {
    %c0_i32 = arith.constant 0 : i32
    %c0_i32_0 = arith.constant 0 : i32
    %c0_i32_1 = arith.constant 0 : i32
    return %c0_i32, %c0_i32_0 : i32, i32
  }
  func.func @transform_2(%arg0: i32) -> (i32, i32) {
    %c0_i32 = arith.constant 0 : i32
    %c0_i32_0 = arith.constant 0 : i32
    %c0_i32_1 = arith.constant 0 : i32
    return %c0_i32, %c0_i32_0 : i32, i32
  }
  func.func @transform_3(%arg0: i32) -> (i32, i32) {
    %c0_i32 = arith.constant 0 : i32
    %c0_i32_0 = arith.constant 0 : i32
    %c0_i32_1 = arith.constant 0 : i32
    return %c0_i32, %c0_i32_0 : i32, i32
  }
  func.func @transform_4(%arg0: i32) -> (i32, i32) {
    %c0_i32 = arith.constant 0 : i32
    %c0_i32_0 = arith.constant 0 : i32
    %c0_i32_1 = arith.constant 0 : i32
    return %c0_i32, %c0_i32_0 : i32, i32
  }
  func.func @transform_5(%arg0: i32) -> (i32, i32) {
    %c0_i32 = arith.constant 0 : i32
    %c0_i32_0 = arith.constant 0 : i32
    return %arg0, %c0_i32 : i32, i32
  }
}

</mosaic_0001>

<bundles_post_ra>
// kernel: tpu_custom_call.1
= control target key start
LH: loop header
LB: loop body
LE: loop exit
PB: predicated region body
PF: predicated region fallthrough
CT: control target
= control target key end

     0   :  { %10 = vsyncpa [#allocation3], 0  ;;  %s626_s0 = inlined_call_operand.hbm [shape: bf16[16,128], index: 0, kind: input, shape index: {}]   ;;  %s627_s1 = inlined_call_operand.hbm [shape: bf16[128,128], index: 1, kind: input, shape index: {}]   ;;  %s628_s2 = inlined_call_operand.vmem [shape: f32[1,128], index: 2, kind: input, shape index: {}]   ;;  %s629_s3 = inlined_call_operand.hbm [shape: bf16[128,128], index: 3, kind: input, shape index: {}]   ;;  %s630_s4 = inlined_call_operand.vmem [shape: f32[1,128], index: 4, kind: input, shape index: {}]   ;;  %s631_s5 = inlined_call_operand.hbm [shape: f32[16,128], index: 5, kind: output, shape index: {}]  }
   0x1   :  { %11 = vsyncpa [#allocation6], 0 }
   0x2   :  { %12 = vsyncpa [#allocation4], 0  ;;  %s516_s18 = smov [#allocation5]   ;;  %s517_s20 = smov [#allocation2]  }
   0x3   :  { %s30_s19 = sshll.u32 %s516_s18, 4  ;;  %s18_s21 = sshll.u32 %s517_s20, 4  ;;  %s31_s19 = int_to_ptr.vmem [resolvable:$true] %s30_s19  ;;  %s556_s21 = int_to_ptr.vmem [resolvable:$true] %s18_s21 }
   0x4   :  { %s422_s24 = scalar_lea.hbm %s627_s1, 1024 }
   0x5   :  { %p423_p0 = scmp.ne.s32.totalorder %s627_s1, %s422_s24  ;;  %p426_p1 = scmp.lt.u32.totalorder %s422_s24, %s627_s1 }
   0x7   :  { %p428_p2 = pnand %p426_p1, %p423_p0 }
   0x9   :  { %431 = shalt.err (!%p428_p2)
}
   0xa   :  { %s432_s29 = scalar_lea.vmem %s31_s19, 1024  ;;  %p437_p4 = scmp.lt.s32.totalorder %s31_s19, %s31_s19 }
   0xb   :  { %p433_p3 = scmp.ne.s32.totalorder %s31_s19, %s432_s29  ;;  %p438_p5 = scmp.lt.s32.totalorder %s432_s29, %s432_s29 }
   0xd   :  { %p439_p6 = por %p438_p5, %p437_p4 }
   0xf   :  { %p440_p7 = pnand %p439_p6, %p433_p3 }
  0x11   :  { %443 = shalt.err (!%p440_p7)
}
  0x12   :  { %s518_s30 = smov 64   ;;  %s519_s6 = smov 4  }
  0x13   :  { %36 = dma.hbm_to_vmem [thread:$0]  %s627_s1, 1024, %s31_s19, [#allocation6], %s518_s30, %s518_s30, %s519_s6  }
  0x14   :  { %s444_s11 = scalar_lea.hbm %s626_s0, 128 }
  0x15   :  { %p445_p8 = scmp.ne.s32.totalorder %s626_s0, %s444_s11  ;;  %p448_p9 = scmp.lt.u32.totalorder %s444_s11, %s626_s0 }
  0x17   :  { %p450_p10 = pnand %p448_p9, %p445_p8 }
  0x19   :  { %453 = shalt.err (!%p450_p10)
}
  0x1a   :  { %s454_s16 = scalar_lea.vmem %s556_s21, 128  ;;  %p459_p12 = scmp.lt.s32.totalorder %s556_s21, %s556_s21 }
  0x1b   :  { %p455_p11 = scmp.ne.s32.totalorder %s556_s21, %s454_s16  ;;  %p460_p13 = scmp.lt.s32.totalorder %s454_s16, %s454_s16 }
  0x1d   :  { %p461_p0 = por %p460_p13, %p459_p12 }
  0x1f   :  { %p462_p1 = pnand %p461_p0, %p455_p11 }
  0x21   :  { %465 = shalt.err (!%p462_p1)
}
  0x22   :  { %24 = dma.hbm_to_vmem [thread:$0]  %s626_s0, 128, %s556_s21, [#allocation3], %s518_s30, %s518_s30, %s519_s6  }
  0x23   :  { %s520_s18 = smov [#allocation7]   ;;  %s466_s23 = scalar_lea.hbm %s629_s3, 1024 }
  0x24   :  { %s44_s19 = sshll.u32 %s520_s18, 4  ;;  %p467_p2 = scmp.ne.s32.totalorder %s629_s3, %s466_s23  ;;  %s45_s19 = int_to_ptr.vmem [resolvable:$true] %s44_s19 }
  0x25   :  { %p470_p3 = scmp.lt.u32.totalorder %s466_s23, %s629_s3 }
  0x27   :  { %p472_p4 = pnand %p470_p3, %p467_p2 }
  0x29   :  { %475 = shalt.err (!%p472_p4)
}
  0x2a   :  { %s476_s28 = scalar_lea.vmem %s45_s19, 1024  ;;  %p481_p6 = scmp.lt.s32.totalorder %s45_s19, %s45_s19 }
  0x2b   :  { %p477_p5 = scmp.ne.s32.totalorder %s45_s19, %s476_s28  ;;  %p482_p7 = scmp.lt.s32.totalorder %s476_s28, %s476_s28 }
  0x2d   :  { %p483_p8 = por %p482_p7, %p481_p6 }
  0x2f   :  { %p484_p9 = pnand %p483_p8, %p477_p5 }
  0x31   :  { %487 = shalt.err (!%p484_p9)
}
  0x32   :  { %50 = dma.hbm_to_vmem [thread:$0]  %s629_s3, 1024, %s45_s19, [#allocation6], %s518_s30, %s518_s30, %s519_s6  }
  0x33   :  { %510 = dma.done.wait [#allocation3], 128  }
  0x34   :  { %511 = vsyncadd [#allocation3], 4294967168 }
  0x35   :  { %512 = dma.done.wait [#allocation6], 2048  }
  0x36   :  { %513 = vsyncadd [#allocation6], 4294965248  ;;  %v521_v0 = vmov 0.0   ;;  %vm522_vm0 = vmmov 0   ;;  %v405_v1 = vld [vmem:[#allocation5] sm:$0xff]   ;;  %v406_v2 = vld [vmem:[#allocation5 + $0x8] sm:$0xff]  }
  0x37   :  { %355 = vmatprep.subr.bf16.mxu0 %v521_v0  ;;  %371 = vmatprep.mubr.msk.bf16.mxu0 %vm522_vm0, %v521_v0  ;;  %v407_v3 = vld [vmem:[#allocation5 + $0x10] sm:$0xff]   ;;  %v414_v4 = vld [vmem:[#allocation7] sm:$0xff]   ;;  %v408_v5 = vld [vmem:[#allocation5 + $0x18] sm:$0xff]   ;;  %s523_s7 = smov [#allocation8]  }
  0x38   :  { %375 = vmatprep.subr.bf16.mxu1 %v521_v0  ;;  %391 = vmatprep.mubr.msk.bf16.mxu1 %vm522_vm0, %v521_v0  ;;  %v415_v6 = vld [vmem:[#allocation7 + $0x8] sm:$0xff]   ;;  %v409_v7 = vld [vmem:[#allocation5 + $0x20] sm:$0xff]   ;;  %v416_v8 = vld [vmem:[#allocation7 + $0x10] sm:$0xff]   ;;  %s305_s8 = sshll.u32 %s523_s7, 4  ;;  %s306_s8 = int_to_ptr.vmem [resolvable:$true] %s305_s8 }
  0x39   :  { %356 = vmatpush3.bf16.msra.mxu0 %v405_v1  ;;  %376 = vmatpush3.bf16.msra.mxu1 %v414_v4  ;;  %v410_v9 = vld [vmem:[#allocation5 + $0x28] sm:$0xff]   ;;  %v417_v10 = vld [vmem:[#allocation7 + $0x18] sm:$0xff]   ;;  %v411_v11 = vld [vmem:[#allocation5 + $0x30] sm:$0xff]   ;;  %p493_p11 = scmp.lt.s32.totalorder %s306_s8, %s306_s8 }
  0x3a   :  { %357 = vmatprep.subr.bf16.mxu0 %v521_v0  ;;  %377 = vmatprep.subr.bf16.mxu1 %v521_v0  ;;  %v418_v12 = vld [vmem:[#allocation7 + $0x20] sm:$0xff]   ;;  %v412_v13 = vld [vmem:[#allocation5 + $0x38] sm:$0xff]   ;;  %v419_v14 = vld [vmem:[#allocation7 + $0x28] sm:$0xff]  }
  0x3b   :  { %v413_v15 = vld [vmem:[#allocation2] sm:$0xff]   ;;  %v420_v16 = vld [vmem:[#allocation7 + $0x30] sm:$0xff]  }
  0x3c   :  { %v421_v17 = vld [vmem:[#allocation7 + $0x38] sm:$0xff]  }
  0x3d   :  { %358 = vmatpush3.bf16.msra.mxu0 %v406_v2  ;;  %378 = vmatpush3.bf16.msra.mxu1 %v415_v6  ;;  %v318_v18 = vld [vmem:[%s628_s2] ss:$0 sm:$0xff]  ;;  %s488_s2 = scalar_lea.vmem %s306_s8, 256 }
  0x3e   :  { %359 = vmatprep.subr.bf16.mxu0 %v521_v0  ;;  %379 = vmatprep.subr.bf16.mxu1 %v521_v0  ;;  %v328_v28 = vld [vmem:[%s630_s4] ss:$0 sm:$0xff]  ;;  %p489_p10 = scmp.ne.s32.totalorder %s306_s8, %s488_s2  ;;  %p494_p12 = scmp.lt.s32.totalorder %s488_s2, %s488_s2 }
  0x40   :  { %p495_p13 = por %p494_p12, %p493_p11 }
  0x41   :  { %360 = vmatpush3.bf16.msra.mxu0 %v407_v3  ;;  %380 = vmatpush3.bf16.msra.mxu1 %v416_v8 }
  0x42   :  { %361 = vmatprep.subr.bf16.mxu0 %v521_v0  ;;  %381 = vmatprep.subr.bf16.mxu1 %v521_v0  ;;  %p496_p0 = pnand %p495_p13, %p489_p10 }
  0x45   :  { %362 = vmatpush3.bf16.msra.mxu0 %v408_v5  ;;  %382 = vmatpush3.bf16.msra.mxu1 %v417_v10 }
  0x46   :  { %363 = vmatprep.subr.bf16.mxu0 %v521_v0  ;;  %383 = vmatprep.subr.bf16.mxu1 %v521_v0 }
  0x49   :  { %364 = vmatpush3.bf16.msra.mxu0 %v409_v7  ;;  %384 = vmatpush3.bf16.msra.mxu1 %v418_v12 }
  0x4a   :  { %365 = vmatprep.subr.bf16.mxu0 %v521_v0  ;;  %385 = vmatprep.subr.bf16.mxu1 %v521_v0 }
  0x4d   :  { %366 = vmatpush3.bf16.msra.mxu0 %v410_v9  ;;  %386 = vmatpush3.bf16.msra.mxu1 %v419_v14 }
  0x4e   :  { %367 = vmatprep.subr.bf16.mxu0 %v521_v0  ;;  %387 = vmatprep.subr.bf16.mxu1 %v521_v0 }
  0x51   :  { %368 = vmatpush3.bf16.msra.mxu0 %v411_v11  ;;  %388 = vmatpush3.bf16.msra.mxu1 %v420_v16 }
  0x52   :  { %369 = vmatprep.subr.bf16.mxu0 %v521_v0  ;;  %389 = vmatprep.subr.bf16.mxu1 %v521_v0 }
  0x55   :  { %370 = vmatpush3.bf16.msra.mxu0 %v412_v13  ;;  %390 = vmatpush3.bf16.msra.mxu1 %v421_v17 }
  0x58   :  { %372 = vmatmul.mubr.bf16.vlgmr.msra.gmra.mrb[0].mxu0 %v413_v15 }
 0x12b   :  { %v176_v19 = vpop.f32.mrb[0].mxu0 }
 0x12c   :  { %v177_v20 = vadd.f32 %v318_v18, %v176_v19  ;;  %v373_v21 = vpop.f32.mrb[1].mxu0 }
 0x12d   :  { %v179_v22 = vpop.f32.mrb[2].mxu0 }
 0x12e   :  { %v180_v23 = vadd.f32 %v318_v18, %v179_v22  ;;  %v374_v24 = vpop.f32.mrb[3].mxu0  ;;  %v183_v25 = vmax.f32 %v177_v20, 0.0 }
 0x130   :  { %v184_v26 = vmax.f32 %v180_v23, 0.0 }
 0x132   :  { %v185_v27 = vpack.c.bf16 %v184_v26, %v183_v25 }
 0x134   :  { %392 = vmatmul.mubr.bf16.vlgmr.msra.gmra.mrb[0].mxu1 %v185_v27 }
 0x207   :  { %v291_v29 = vpop.f32.mrb[0].mxu1 }
 0x208   :  { %v292_v30 = vadd.f32 %v328_v28, %v291_v29  ;;  %v393_v31 = vpop.f32.mrb[1].mxu1 }
 0x209   :  { %v294_v32 = vpop.f32.mrb[2].mxu1 }
 0x20a   :  { %298 = vst [vmem:[#allocation8] sm:$0xff] %v292_v30  ;;  %v295_v33 = vadd.f32 %v328_v28, %v294_v32  ;;  %v394_v34 = vpop.f32.mrb[3].mxu1 }
 0x20c   :  { %299 = vst [vmem:[#allocation8 + $0x8] sm:$0xff] %v295_v33 }
 0x20d   :  { %499 = shalt.err (!%p496_p0)
}
 0x20e   :  { %s500_s10 = scalar_lea.hbm %s631_s5, 256 }
 0x20f   :  { %p501_p1 = scmp.ne.s32.totalorder %s631_s5, %s500_s10  ;;  %p504_p2 = scmp.lt.u32.totalorder %s500_s10, %s631_s5 }
 0x211   :  { %p506_p3 = pnand %p504_p2, %p501_p1 }
 0x213   :  { %509 = shalt.err (!%p506_p3)
}
 0x214   :  { %s524_s15 = smov 128   ;;  %s525_s16 = smov 8  }
 0x215   :  { %311 = dma.vmem_to_hbm [thread:$0]  %s306_s8, 256, %s631_s5, [#allocation4], %s524_s15, %s524_s15, %s525_s16  }
 0x216   :  { %514 = dma.done.wait [#allocation4], 256  }
 0x217   :  { %515 = vsyncadd [#allocation4], 4294967040 }
 0x218   :  { %315 = vsyncpa [#allocation3], 1 }
 0x219   :  { %316 = vsyncpa [#allocation6], 1 }
 0x21a   :  { %317 = vsyncpa [#allocation4], 1 }

</bundles_post_ra>
